<compile_context>
chip_gen: v6e
topology: v6e:2x2x1
jax: 0.10.0
libtpu: 0.0.40
codegen_flags: <defaults>
</compile_context>

<pallas_src>
import functools

import jax
import jax.numpy as jnp
from jax.experimental import pallas as pl
from jax.experimental.pallas import tpu as pltpu

_NEG_BIG = -1e30  # bias padding for padded vocab columns (exp underflows to 0)


def _round_up(x, m):
    return (x + m - 1) // m * m


# ----------------------------------------------------------------------------
# Generation-aware VMEM budgeting + tile selection
# ----------------------------------------------------------------------------
def _vmem_info():
    """(physical_vmem_bytes, usable_budget_bytes) — conservative fallback 64 MiB."""
    phys = 64 * 1024 * 1024
    try:
        cap = getattr(pltpu.get_tpu_info(), "vmem_capacity_bytes", None)
        if cap:
            phys = int(cap)
    except Exception:
        pass
    # 5/8 of physical: 40 MiB on v7x (64 MiB), 80 MiB on v5e/v6e (128 MiB).
    return phys, (phys * 5) // 8


def _tile_footprint(tm, H, tv, x_bytes, w_bytes):
    act = 2 * tm * H * x_bytes          # double-buffered activation tile
    wgt = 2 * tv * H * w_bytes          # double-buffered (streamed) weight tile
    small = 2 * (tv * 4 + tm * 4 + tm * 4) + 3 * tm * 4   # bias/ids/out/scratch
    temps = 3 * tm * tv * 4             # f32 logits / exp temporaries
    return act + wgt + small + temps + (2 << 20)  # + Mosaic internal headroom


def _select_tiles(tm_req, tv_req, N, H, V, x_bytes, w_bytes, budget):
    """Pick the largest row tile tm that fits the VMEM budget (tm is the
    arithmetic-intensity lever: weight HBM traffic ~ (N/tm)*V*H*bytes)."""
    row_cap = _round_up(N, 8)
    v128 = _round_up(V, 128)
    tv = min(_round_up(tv_req, 128), v128)
    tm_candidates = ([_round_up(int(tm_req), 8)] if tm_req is not None
                     else [1024, 768, 512, 384, 256, 128, 64, 32, 16, 8])
    while True:
        for c in tm_candidates:
            c = min(c, row_cap)
            if _tile_footprint(c, H, tv, x_bytes, w_bytes) <= budget:
                return c, tv
        new_tv = max(128, (tv // 2) // 128 * 128)
        if new_tv == tv:
            return min(8, row_cap), tv   # degenerate fallback (huge H)
        tv = new_tv


# ----------------------------------------------------------------------------
# Kernel: fused linear -> log_softmax -> gather(selected_token_ids)
# ----------------------------------------------------------------------------
def _per_token_logp_kernel(x_ref, w_ref, b_ref, ids_ref, out_ref,
                           m_sc, s_sc, sel_sc, *, inv_temperature, tv):
    k = pl.program_id(1)          # vocab (reduction) axis, innermost

    @pl.when(k == 0)
    def _():
        m_sc[...] = jnp.full_like(m_sc, -jnp.inf)
        s_sc[...] = jnp.zeros_like(s_sc)
        sel_sc[...] = jnp.zeros_like(sel_sc)

    # (tm, H) x (tv, H) -> (tm, tv), contracting over H.  Inputs keep their
    # incoming dtype (bf16 stays bf16); accumulation is f32 on the MXU.
    logits = jax.lax.dot_general(
        x_ref[...], w_ref[...],
        dimension_numbers=(((1,), (1,)), ((), ())),
        preferred_element_type=jnp.float32,
    )
    logits = logits + b_ref[...]
    if inv_temperature != 1.0:
        logits = logits * inv_temperature

    # gather selected logit: compare a loop-invariant local iota against
    # (ids - k*tv) — avoids building a (tm, tv) global-column tensor per step.
    local_ids = ids_ref[...] - k * tv                       # (tm, 1) int32
    col = jax.lax.broadcasted_iota(jnp.int32, logits.shape, 1)
    sel_sc[...] += jnp.sum(
        jnp.where(col == local_ids, logits, 0.0), axis=-1, keepdims=True)

    # online logsumexp over the vocab axis
    m_new = jnp.maximum(m_sc[...], jnp.max(logits, axis=-1, keepdims=True))
    s_sc[...] = s_sc[...] * jnp.exp(m_sc[...] - m_new) + jnp.sum(
        jnp.exp(logits - m_new), axis=-1, keepdims=True)
    m_sc[...] = m_new

    @pl.when(k == pl.num_programs(1) - 1)
    def _():
        # per_token_logp = selected_logit - logsumexp(logits)
        out_ref[...] = sel_sc[...] - (m_sc[...] + jnp.log(s_sc[...]))


def fused_linear_per_token_logps(x, weight, bias, selected_token_ids, *,
                                 temperature=1.0, tm=None, tv=512,
                                 cast_matmul_to_bf16=False):
    """Per-token log-probs of the selected tokens, shape (N,) float32."""
    if cast_matmul_to_bf16:
        # Optional: run the matmul in bf16 (full MXU rate, half the weight
        # HBM bytes) while keeping the f32 bias / logsumexp / accumulator path.
        if x.dtype == jnp.float32:
            x = x.astype(jnp.bfloat16)
        if weight.dtype == jnp.float32:
            weight = weight.astype(jnp.bfloat16)

    N, H = x.shape
    V = weight.shape[0]

    ids = selected_token_ids.reshape(N).astype(jnp.int32)
    if bias is None:
        bias = jnp.zeros((V,), jnp.float32)
    b = bias.astype(jnp.float32)

    # --- generation-aware tiling & padding -----------------------------------
    x_bytes = jnp.dtype(x.dtype).itemsize
    w_bytes = jnp.dtype(weight.dtype).itemsize
    phys_vmem, budget = _vmem_info()
    tm, tv = _select_tiles(tm, tv, N, H, V, x_bytes, w_bytes, budget)

    n_pad = _round_up(N, tm)
    v_pad = _round_up(V, tv)

    if n_pad != N:
        x = jnp.pad(x, ((0, n_pad - N), (0, 0)))
        ids = jnp.pad(ids, (0, n_pad - N))     # pad ids with 0 (< V); rows sliced off
    if v_pad != V:
        weight = jnp.pad(weight, ((0, v_pad - V), (0, 0)))
        b = jnp.pad(b, (0, v_pad - V), constant_values=_NEG_BIG)

    ids2 = ids.reshape(n_pad, 1)
    b2 = b.reshape(1, v_pad)

    vmem_limit = int(min(phys_vmem - (4 << 20),
                         max(budget, _tile_footprint(tm, H, tv, x_bytes, w_bytes))))

    kernel = functools.partial(_per_token_logp_kernel,
                               inv_temperature=float(1.0 / temperature), tv=tv)
    out = pl.pallas_call(
        kernel,
        out_shape=jax.ShapeDtypeStruct((n_pad, 1), jnp.float32),
        grid_spec=pltpu.PrefetchScalarGridSpec(
            num_scalar_prefetch=0,
            grid=(n_pad // tm, v_pad // tv),     # (rows, vocab); vocab innermost
            in_specs=[
                pl.BlockSpec((tm, H), lambda i, k: (i, 0)),   # activation tile
                pl.BlockSpec((tv, H), lambda i, k: (k, 0)),   # weight tile (streamed)
                pl.BlockSpec((1, tv), lambda i, k: (0, k)),   # bias tile
                pl.BlockSpec((tm, 1), lambda i, k: (i, 0)),   # selected ids
            ],
            out_specs=pl.BlockSpec((tm, 1), lambda i, k: (i, 0)),
            scratch_shapes=[pltpu.VMEM((tm, 1), jnp.float32),   # running max
                            pltpu.VMEM((tm, 1), jnp.float32),   # running sum-exp
                            pltpu.VMEM((tm, 1), jnp.float32)],  # selected logit
        ),
        compiler_params=pltpu.CompilerParams(
            dimension_semantics=("parallel", "arbitrary"),
            vmem_limit_bytes=vmem_limit),
    )(x, weight, b2, ids2)
    return out[:N, 0]


# ----------------------------------------------------------------------------
# GRPO per-token loss + masked reductions (plain JAX; tiny (B,T) problem)
# ----------------------------------------------------------------------------
def grpo_loss_and_metrics(per_token_logps, ref_per_token_logps,
                          old_per_token_logps, attention_mask, advantages, *,
                          beta, epsilon_low, epsilon_high, loss_type,
                          max_completion_length):
    p = per_token_logps.astype(jnp.float32)
    old = old_per_token_logps.astype(jnp.float32)
    mask = attention_mask.astype(jnp.float32)
    adv = advantages.astype(jnp.float32)[:, None]

    coef_1 = jnp.exp(p - old)
    coef_2 = jnp.clip(coef_1, 1.0 - epsilon_low, 1.0 + epsilon_high)
    per_token_loss = -jnp.minimum(coef_1 * adv, coef_2 * adv)

    denom = jnp.maximum(mask.sum(), 1.0)

    metrics = []
    if beta != 0.0:
        d = ref_per_token_logps.astype(jnp.float32) - p
        kl_div = jnp.exp(d) - d - 1.0          # k3 estimator
        per_token_loss = per_token_loss + beta * kl_div
        metrics.append((kl_div * mask).sum() / denom)

    if loss_type == "grpo":
        row = (per_token_loss * mask).sum(-1) / jnp.maximum(mask.sum(-1), 1.0)
        loss = row.sum() / mask.shape[0]
    elif loss_type == "bnpo":
        loss = (per_token_loss * mask).sum() / denom
    elif loss_type == "dr_grpo":
        if max_completion_length is None:
            raise ValueError(
                "max_completion_length must be provided for loss_type 'dr_grpo'")
        loss = (per_token_loss * mask).sum() / (mask.shape[0] * max_completion_length)
    else:
        raise ValueError(f"Unknown loss type: {loss_type}")

    is_clipped = (((coef_1 < 1.0 - epsilon_low) & (adv < 0)) |
                  ((coef_1 > 1.0 + epsilon_high) & (adv > 0)))
    metrics.append((is_clipped.astype(jnp.float32) * mask).sum() / denom)
    return loss, tuple(metrics)


# ----------------------------------------------------------------------------
# Module-equivalent wrapper
# ----------------------------------------------------------------------------
class LigerFusedLinearGRPOLoss:
    def __init__(self, beta=0.04, compiled=True, use_ref_model=True, chunk_size=1,
                 epsilon_low=0.2, epsilon_high=0.2, loss_type="bnpo",
                 max_completion_length=None, temperature=1.0,
                 cast_f32_matmul_to_bf16=False):
        self.beta = beta
        self.compiled = compiled              # unused: scheduling-only in torch
        self.use_ref_model = use_ref_model
        self.chunk_size = chunk_size          # unused: chunking doesn't change fwd result
        self.epsilon_low = epsilon_low
        self.epsilon_high = epsilon_high
        self.loss_type = loss_type
        self.max_completion_length = max_completion_length
        self.temperature = temperature
        # perf knob: run f32 matmuls in bf16 on the MXU (f32 logsumexp kept)
        self.cast_f32_matmul_to_bf16 = cast_f32_matmul_to_bf16

    def __call__(self, _input, lin_weight, selected_token_ids, attention_mask,
                 advantages, bias=None, ref_per_token_logps=None,
                 old_per_token_logps=None, ref_input=None, ref_weight=None,
                 ref_bias=None):
        B, T = selected_token_ids.shape

        per_token_logps = fused_linear_per_token_logps(
            _input, lin_weight, bias, selected_token_ids,
            temperature=self.temperature,
            cast_matmul_to_bf16=self.cast_f32_matmul_to_bf16).reshape(B, T)

        if ref_per_token_logps is None:
            if self.use_ref_model and ref_input is not None and ref_weight is not None:
                ref_per_token_logps = fused_linear_per_token_logps(
                    ref_input, ref_weight, ref_bias, selected_token_ids,
                    temperature=self.temperature,
                    cast_matmul_to_bf16=self.cast_f32_matmul_to_bf16).reshape(B, T)
            else:
                # detach() equivalent (forward only): KL term becomes 0.
                ref_per_token_logps = per_token_logps

        if old_per_token_logps is None:
            old_per_token_logps = per_token_logps      # detach() equivalent (fwd only)

        loss, metrics = grpo_loss_and_metrics(
            per_token_logps, ref_per_token_logps, old_per_token_logps,
            attention_mask, advantages,
            beta=self.beta, epsilon_low=self.epsilon_low,
            epsilon_high=self.epsilon_high, loss_type=self.loss_type,
            max_completion_length=self.max_completion_length)
        return loss, metrics


# ----------------------------------------------------------------------------
# Pure-JAX reference for verification
# ----------------------------------------------------------------------------
def _reference(x, w, b, ids, mask, adv, old, rx, rw, rb, *, beta, el, eh,
               temperature, loss_type="bnpo", max_completion_length=None):
    B, T = ids.shape
    V = w.shape[0]

    def logps(inp, wt, bs):
        logits = (inp.astype(jnp.float32) @ wt.astype(jnp.float32).T
                  + bs.astype(jnp.float32)) / temperature
        lp = jax.nn.log_softmax(logits, axis=-1).reshape(B, T, V)
        return jnp.take_along_axis(lp, ids[..., None], axis=-1)[..., 0]

    p = logps(x, w, b)
    ref = logps(rx, rw, rb) if rx is not None else p
    old = old if old is not None else p

    coef_1 = jnp.exp(p - old)
    coef_2 = jnp.clip(coef_1, 1 - el, 1 + eh)
    per_tok = -jnp.minimum(coef_1 * adv[:, None], coef_2 * adv[:, None])
    denom = jnp.maximum(mask.sum(), 1.0)

    metrics = []
    if beta != 0.0:
        d = ref - p
        kl = jnp.exp(d) - d - 1.0
        per_tok = per_tok + beta * kl
        metrics.append((kl * mask).sum() / denom)

    if loss_type == "grpo":
        loss = ((per_tok * mask).sum(-1) / jnp.maximum(mask.sum(-1), 1.0)).sum() / mask.shape[0]
    elif loss_type == "bnpo":
        loss = (per_tok * mask).sum() / denom
    else:  # dr_grpo
        loss = (per_tok * mask).sum() / (mask.shape[0] * max_completion_length)

    is_clipped = (((coef_1 < 1 - el) & (adv[:, None] < 0)) |
                  ((coef_1 > 1 + eh) & (adv[:, None] > 0)))
    metrics.append((is_clipped.astype(jnp.float32) * mask).sum() / denom)
    return loss, tuple(metrics)


if __name__ == "__main__":
    B, T, H, V = 2, 8, 32, 256
    N = B * T
    key = jax.random.PRNGKey(0)
    ks = jax.random.split(key, 12)

    _input = jax.random.normal(ks[0], (N, H), jnp.float32) * 0.5
    lin_weight = jax.random.normal(ks[1], (V, H), jnp.float32) * 0.1
    bias = jax.random.normal(ks[2], (V,), jnp.float32) * 0.05
    selected_token_ids = jax.random.randint(ks[3], (B, T), 0, V, jnp.int32)
    attention_mask = jnp.ones((B, T), jnp.float32).at[1, T - 2:].set(0.0)
    advantages = jax.random.normal(ks[4], (B,), jnp.float32)
    old_per_token_logps = -jnp.abs(jax.random.normal(ks[5], (B, T), jnp.float32)) - 3.0
    ref_input = jax.random.normal(ks[6], (N, H), jnp.float32) * 0.5
    ref_weight = jax.random.normal(ks[7], (V, H), jnp.float32) * 0.1
    ref_bias = jax.random.normal(ks[8], (V,), jnp.float32) * 0.05

    # ---- check 1: bnpo, beta != 0, f32 inputs, ref model --------------------
    loss_mod = LigerFusedLinearGRPOLoss(beta=0.04, epsilon_low=0.2,
                                        epsilon_high=0.2, loss_type="bnpo",
                                        temperature=1.0, use_ref_model=True)
    loss, metrics = loss_mod(_input, lin_weight, selected_token_ids,
                             attention_mask, advantages, bias=bias,
                             old_per_token_logps=old_per_token_logps,
                             ref_input=ref_input, ref_weight=ref_weight,
                             ref_bias=ref_bias)
    loss = jax.block_until_ready(loss)
    metrics = jax.block_until_ready(metrics)

    ref_loss, ref_metrics = _reference(
        _input, lin_weight, bias, selected_token_ids, attention_mask,
        advantages, old_per_token_logps, ref_input, ref_weight, ref_bias,
        beta=0.04, el=0.2, eh=0.2, temperature=1.0, loss_type="bnpo")
    assert jnp.allclose(loss, ref_loss, atol=1e-4, rtol=1e-4), (loss, ref_loss)
    assert jnp.allclose(metrics[0], ref_metrics[0], atol=1e-4, rtol=1e-4)
    assert jnp.allclose(metrics[1], ref_metrics[1], atol=1e-4, rtol=1e-4)

    # ---- check 2: non-multiple vocab (padding path), grpo loss, temperature --
    V2 = 200
    w2 = jax.random.normal(ks[9], (V2, H), jnp.float32) * 0.1
    b2 = jax.random.normal(ks[10], (V2,), jnp.float32) * 0.05
    ids2 = jax.random.randint(ks[11], (B, T), 0, V2, jnp.int32)
    loss_mod2 = LigerFusedLinearGRPOLoss(beta=0.0, loss_type="grpo",
                                         temperature=0.8, use_ref_model=False)
    loss2, metrics2 = loss_mod2(_input, w2, ids2, attention_mask, advantages,
                                bias=b2, old_per_token_logps=old_per_token_logps)
    loss2 = jax.block_until_ready(loss2)
    ref_loss2, ref_metrics2 = _reference(
        _input, w2, b2, ids2, attention_mask, advantages, old_per_token_logps,
        None, None, None, beta=0.0, el=0.2, eh=0.2, temperature=0.8,
        loss_type="grpo")
    assert jnp.allclose(loss2, ref_loss2, atol=1e-4, rtol=1e-4), (loss2, ref_loss2)
    assert jnp.allclose(metrics2[0], ref_metrics2[0], atol=1e-4, rtol=1e-4)

    # ---- check 3: bf16 inputs stay bf16 inside the kernel (no f32 upcast) ----
    loss3, _ = loss_mod(_input.astype(jnp.bfloat16),
                        lin_weight.astype(jnp.bfloat16),
                        selected_token_ids, attention_mask, advantages,
                        bias=bias, old_per_token_logps=old_per_token_logps,
                        ref_input=ref_input.astype(jnp.bfloat16),
                        ref_weight=ref_weight.astype(jnp.bfloat16),
                        ref_bias=ref_bias)
    loss3 = jax.block_until_ready(loss3)
    assert bool(jnp.isfinite(loss3)), loss3
    assert jnp.allclose(loss3, ref_loss, atol=1e-1), (loss3, ref_loss)

    # ---- check 4: dr_grpo loss type ------------------------------------------
    loss_mod4 = LigerFusedLinearGRPOLoss(beta=0.04, loss_type="dr_grpo",
                                         max_completion_length=T,
                                         temperature=1.0, use_ref_model=True)
    loss4, _ = loss_mod4(_input, lin_weight, selected_token_ids, attention_mask,
                         advantages, bias=bias,
                         old_per_token_logps=old_per_token_logps,
                         ref_input=ref_input, ref_weight=ref_weight,
                         ref_bias=ref_bias)
    loss4 = jax.block_until_ready(loss4)
    ref_loss4, _ = _reference(
        _input, lin_weight, bias, selected_token_ids, attention_mask,
        advantages, old_per_token_logps, ref_input, ref_weight, ref_bias,
        beta=0.04, el=0.2, eh=0.2, temperature=1.0, loss_type="dr_grpo",
        max_completion_length=T)
    assert jnp.allclose(loss4, ref_loss4, atol=1e-4, rtol=1e-4), (loss4, ref_loss4)

    # ---- check 5: optional bf16-cast matmul path (perf mode) ------------------
    loss_mod5 = LigerFusedLinearGRPOLoss(beta=0.04, loss_type="bnpo",
                                         temperature=1.0, use_ref_model=True,
                                         cast_f32_matmul_to_bf16=True)
    loss5, _ = loss_mod5(_input, lin_weight, selected_token_ids, attention_mask,
                         advantages, bias=bias,
                         old_per_token_logps=old_per_token_logps,
                         ref_input=ref_input, ref_weight=ref_weight,
                         ref_bias=ref_bias)
    loss5 = jax.block_until_ready(loss5)
    assert bool(jnp.isfinite(loss5)), loss5
    assert jnp.allclose(loss5, ref_loss, atol=1e-1), (loss5, ref_loss)

    print("KERNEL_OK")
</pallas_src>

<mosaic_0001>
module attributes {stable_mosaic.version = 11 : i64} {
  func.func @_per_token_logp_kernel(%arg0: i32, %arg1: i32, %arg2: memref<16x32xf32, #tpu.memory_space<vmem>>, %arg3: memref<256x32xf32, #tpu.memory_space<vmem>>, %arg4: memref<1x256xf32, #tpu.memory_space<vmem>>, %arg5: memref<16x1xi32, #tpu.memory_space<vmem>>, %arg6: memref<16x1xf32, #tpu.memory_space<vmem>>, %arg7: memref<16x1xf32, #tpu.memory_space<vmem>>, %arg8: memref<16x1xf32, #tpu.memory_space<vmem>>, %arg9: memref<16x1xf32, #tpu.memory_space<vmem>>) attributes {dimension_semantics = [#tpu.dimension_semantics<parallel>, #tpu.dimension_semantics<arbitrary>], iteration_bounds = array<i64: 1, 1>, scalar_prefetch = 0 : i64, scratch_operands = 3 : i64, tpu.core_type = #tpu.core_type<tc>, window_params = [{transform_indices = @transform_0, window_bounds = array<i64: 16, 32>}, {transform_indices = @transform_1, window_bounds = array<i64: 256, 32>}, {transform_indices = @transform_2, window_bounds = array<i64: 1, 256>}, {transform_indices = @transform_3, window_bounds = array<i64: 16, 1>}, {transform_indices = @transform_4, window_bounds = array<i64: 16, 1>}]} {
    %c0_i32 = arith.constant 0 : i32
    %0 = arith.cmpi eq, %arg1, %c0_i32 : i32
    %1 = arith.extui %0 : i1 to i32
    %c0_i32_0 = arith.constant 0 : i32
    %2 = arith.cmpi ne, %1, %c0_i32_0 : i32
    scf.if %2 {
      %cst_28 = arith.constant 0xFF800000 : f32
      %43 = vector.broadcast %cst_28 : f32 to vector<16x1xf32>
      %c0_29 = arith.constant 0 : index
      %c0_30 = arith.constant 0 : index
      %44 = vector.load %arg7[%c0_29, %c0_30] : memref<16x1xf32, #tpu.memory_space<vmem>>, vector<16x1xf32>
      tpu.vector_store %arg7[%c0_29, %c0_30], %43 {strides = array<i32>} : memref<16x1xf32, #tpu.memory_space<vmem>>, vector<16x1xf32>,
      %cst_31 = arith.constant 0.000000e+00 : f32
      %45 = vector.broadcast %cst_31 : f32 to vector<16x1xf32>
      %c0_32 = arith.constant 0 : index
      %c0_33 = arith.constant 0 : index
      %46 = vector.load %arg8[%c0_32, %c0_33] : memref<16x1xf32, #tpu.memory_space<vmem>>, vector<16x1xf32>
      tpu.vector_store %arg8[%c0_32, %c0_33], %45 {strides = array<i32>} : memref<16x1xf32, #tpu.memory_space<vmem>>, vector<16x1xf32>,
      %cst_34 = arith.constant 0.000000e+00 : f32
      %47 = vector.broadcast %cst_34 : f32 to vector<16x1xf32>
      %c0_35 = arith.constant 0 : index
      %c0_36 = arith.constant 0 : index
      %48 = vector.load %arg9[%c0_35, %c0_36] : memref<16x1xf32, #tpu.memory_space<vmem>>, vector<16x1xf32>
      tpu.vector_store %arg9[%c0_35, %c0_36], %47 {strides = array<i32>} : memref<16x1xf32, #tpu.memory_space<vmem>>, vector<16x1xf32>,
    } else {
    }
    %c0 = arith.constant 0 : index
    %c0_1 = arith.constant 0 : index
    %3 = vector.load %arg2[%c0, %c0_1] : memref<16x32xf32, #tpu.memory_space<vmem>>, vector<16x32xf32>
    %c0_2 = arith.constant 0 : index
    %c0_3 = arith.constant 0 : index
    %4 = vector.load %arg3[%c0_2, %c0_3] : memref<256x32xf32, #tpu.memory_space<vmem>>, vector<256x32xf32>
    %cst = arith.constant dense<0.000000e+00> : vector<16x256xf32>
    %5 = tpu.matmul %3, %4, %cst {dimension_numbers = #tpu.dot_dimension_numbers<[1], [1], [0], [0], [0, 0, 1, 0], [], []>} : vector<16x32xf32>, vector<256x32xf32>, vector<16x256xf32> -> vector<16x256xf32>
    %c0_4 = arith.constant 0 : index
    %c0_5 = arith.constant 0 : index
    %6 = vector.load %arg4[%c0_4, %c0_5] : memref<1x256xf32, #tpu.memory_space<vmem>>, vector<1x256xf32>
    %7 = vector.broadcast %6 : vector<1x256xf32> to vector<16x256xf32>
    %8 = arith.addf %5, %7 : vector<16x256xf32>
    %c0_6 = arith.constant 0 : index
    %c0_7 = arith.constant 0 : index
    %9 = vector.load %arg5[%c0_6, %c0_7] : memref<16x1xi32, #tpu.memory_space<vmem>>, vector<16x1xi32>
    %c256_i32 = arith.constant 256 : i32
    %10 = arith.muli %arg1, %c256_i32 : i32
    %11 = vector.broadcast %10 : i32 to vector<16x1xi32>
    %12 = arith.subi %9, %11 : vector<16x1xi32>
    %13 = tpu.iota {dimensions = array<i32: 1>} : vector<16x256xi32>
    %c0_8 = arith.constant 0 : index
    %c0_9 = arith.constant 0 : index
    %14 = vector.load %arg9[%c0_8, %c0_9] : memref<16x1xf32, #tpu.memory_space<vmem>>, vector<16x1xf32>
    %15 = vector.broadcast %12 : vector<16x1xi32> to vector<16x256xi32>
    %16 = arith.cmpi eq, %13, %15 : vector<16x256xi32>
    %cst_10 = arith.constant 0.000000e+00 : f32
    %17 = vector.broadcast %cst_10 : f32 to vector<16x256xf32>
    %18 = arith.select %16, %8, %17 : vector<16x256xi1>, vector<16x256xf32>
    %cst_11 = arith.constant dense<0.000000e+00> : vector<16xf32>
    %19 = vector.multi_reduction <add>, %18, %cst_11 [1] : vector<16x256xf32> to vector<16xf32>
    %20 = vector.shape_cast %19 : vector<16xf32> to vector<16x1xf32>
    %21 = arith.addf %14, %20 : vector<16x1xf32>
    %c0_12 = arith.constant 0 : index
    %c0_13 = arith.constant 0 : index
    %22 = vector.load %arg9[%c0_12, %c0_13] : memref<16x1xf32, #tpu.memory_space<vmem>>, vector<16x1xf32>
    tpu.vector_store %arg9[%c0_12, %c0_13], %21 {strides = array<i32>} : memref<16x1xf32, #tpu.memory_space<vmem>>, vector<16x1xf32>,
    %c0_14 = arith.constant 0 : index
    %c0_15 = arith.constant 0 : index
    %23 = vector.load %arg7[%c0_14, %c0_15] : memref<16x1xf32, #tpu.memory_space<vmem>>, vector<16x1xf32>
    %cst_16 = arith.constant dense<0xFF800000> : vector<16xf32>
    %24 = vector.multi_reduction <maximumf>, %8, %cst_16 [1] : vector<16x256xf32> to vector<16xf32>
    %25 = vector.shape_cast %24 : vector<16xf32> to vector<16x1xf32>
    %26 = arith.maximumf %23, %25 : vector<16x1xf32>
    %c0_17 = arith.constant 0 : index
    %c0_18 = arith.constant 0 : index
    %27 = vector.load %arg8[%c0_17, %c0_18] : memref<16x1xf32, #tpu.memory_space<vmem>>, vector<16x1xf32>
    %c0_19 = arith.constant 0 : index
    %c0_20 = arith.constant 0 : index
    %28 = vector.load %arg7[%c0_19, %c0_20] : memref<16x1xf32, #tpu.memory_space<vmem>>, vector<16x1xf32>
    %29 = arith.subf %28, %26 : vector<16x1xf32>
    %30 = math.exp %29 : vector<16x1xf32>
    %31 = arith.mulf %27, %30 : vector<16x1xf32>
    %32 = vector.broadcast %26 : vector<16x1xf32> to vector<16x256xf32>
    %33 = arith.subf %8, %32 : vector<16x256xf32>
    %34 = math.exp %33 : vector<16x256xf32>
    %cst_21 = arith.constant dense<0.000000e+00> : vector<16xf32>
    %35 = vector.multi_reduction <add>, %34, %cst_21 [1] : vector<16x256xf32> to vector<16xf32>
    %36 = vector.shape_cast %35 : vector<16xf32> to vector<16x1xf32>
    %37 = arith.addf %31, %36 : vector<16x1xf32>
    %c0_22 = arith.constant 0 : index
    %c0_23 = arith.constant 0 : index
    %38 = vector.load %arg8[%c0_22, %c0_23] : memref<16x1xf32, #tpu.memory_space<vmem>>, vector<16x1xf32>
    tpu.vector_store %arg8[%c0_22, %c0_23], %37 {strides = array<i32>} : memref<16x1xf32, #tpu.memory_space<vmem>>, vector<16x1xf32>,
    %c0_24 = arith.constant 0 : index
    %c0_25 = arith.constant 0 : index
    %39 = vector.load %arg7[%c0_24, %c0_25] : memref<16x1xf32, #tpu.memory_space<vmem>>, vector<16x1xf32>
    tpu.vector_store %arg7[%c0_24, %c0_25], %26 {strides = array<i32>} : memref<16x1xf32, #tpu.memory_space<vmem>>, vector<16x1xf32>,
    %c0_i32_26 = arith.constant 0 : i32
    %40 = arith.cmpi eq, %arg1, %c0_i32_26 : i32
    %41 = arith.extui %40 : i1 to i32
    %c0_i32_27 = arith.constant 0 : i32
    %42 = arith.cmpi ne, %41, %c0_i32_27 : i32
    scf.if %42 {
      %c0_28 = arith.constant 0 : index
      %c0_29 = arith.constant 0 : index
      %43 = vector.load %arg9[%c0_28, %c0_29] : memref<16x1xf32, #tpu.memory_space<vmem>>, vector<16x1xf32>
      %c0_30 = arith.constant 0 : index
      %c0_31 = arith.constant 0 : index
      %44 = vector.load %arg7[%c0_30, %c0_31] : memref<16x1xf32, #tpu.memory_space<vmem>>, vector<16x1xf32>
      %c0_32 = arith.constant 0 : index
      %c0_33 = arith.constant 0 : index
      %45 = vector.load %arg8[%c0_32, %c0_33] : memref<16x1xf32, #tpu.memory_space<vmem>>, vector<16x1xf32>
      %46 = math.log %45 : vector<16x1xf32>
      %47 = arith.addf %44, %46 : vector<16x1xf32>
      %48 = arith.subf %43, %47 : vector<16x1xf32>
      %c0_34 = arith.constant 0 : index
      %c0_35 = arith.constant 0 : index
      %49 = vector.load %arg6[%c0_34, %c0_35] : memref<16x1xf32, #tpu.memory_space<vmem>>, vector<16x1xf32>
      tpu.vector_store %arg6[%c0_34, %c0_35], %48 {strides = array<i32>} : memref<16x1xf32, #tpu.memory_space<vmem>>, vector<16x1xf32>,
    } else {
    }
    return
  }
  func.func @transform_0(%arg0: i32, %arg1: i32) -> (i32, i32) {
    %c0_i32 = arith.constant 0 : i32
    %c0_i32_0 = arith.constant 0 : i32
    return %arg0, %c0_i32 : i32, i32
  }
  func.func @transform_1(%arg0: i32, %arg1: i32) -> (i32, i32) {
    %c0_i32 = arith.constant 0 : i32
    %c0_i32_0 = arith.constant 0 : i32
    return %arg1, %c0_i32 : i32, i32
  }
  func.func @transform_2(%arg0: i32, %arg1: i32) -> (i32, i32) {
    %c0_i32 = arith.constant 0 : i32
    %c0_i32_0 = arith.constant 0 : i32
    return %c0_i32, %arg1 : i32, i32
  }
  func.func @transform_3(%arg0: i32, %arg1: i32) -> (i32, i32) {
    %c0_i32 = arith.constant 0 : i32
    %c0_i32_0 = arith.constant 0 : i32
    return %arg0, %c0_i32 : i32, i32
  }
  func.func @transform_4(%arg0: i32, %arg1: i32) -> (i32, i32) {
    %c0_i32 = arith.constant 0 : i32
    %c0_i32_0 = arith.constant 0 : i32
    return %arg0, %c0_i32 : i32, i32
  }
}

</mosaic_0001>

<bundles_post_ra>
// kernel: tpu_custom_call.1
= control target key start
LH: loop header
LB: loop body
LE: loop exit
PB: predicated region body
PF: predicated region fallthrough
CT: control target
= control target key end

     0   :  { %vm74_vm0 = vcmask 261120   ;;  %v490_v34 = vmov 0   ;;  %vm21_vm1 = vcmask 7168   ;;  %v491_v35 = vmov -inf   ;;  %s725_s1 = inlined_call_operand.vmem [shape: f32[256,32], index: 1, kind: input, shape index: {}]   ;;  %s726_s0 = inlined_call_operand.vmem [shape: f32[16,32], index: 0, kind: input, shape index: {}]   ;;  %s727_s2 = inlined_call_operand.vmem [shape: f32[1,256], index: 2, kind: input, shape index: {}]   ;;  %s728_s3 = inlined_call_operand.vmem [shape: s32[16,1], index: 3, kind: input, shape index: {}]   ;;  %s729_s4 = inlined_call_operand.vmem [shape: f32[16,1], index: 4, kind: output, shape index: {}]  }
   0x1   :  { %v61_v0 = vld [vmem:[%s725_s1 + $0xf8] sm:$0xff]  ;;  %v60_v2 = vld [vmem:[%s725_s1 + $0xf0] sm:$0xff]  ;;  %v59_v4 = vld [vmem:[%s725_s1 + $0xe8] sm:$0xff]  ;;  %473 = vset.pattern.permute.xlu0 %v490_v34  ;;  %472 = vset.pattern.permute.xlu1 %v490_v34  ;;  %22 = vst.msk [vmem:[#allocation2] sm:$0xff] %vm21_vm1, %v491_v35  ;;  %v64_v36 = vlaneseq  ;;  %v492_v54 = vmov 0.0  }
   0x2   :  { %v45_v1 = vld [vmem:[%s725_s1 + $0x78] sm:$0xff]  ;;  %401 = vmatprep.subr.msk.mxu0 %vm74_vm0, %v61_v0  ;;  %437 = vmatprep.subr.msk.mxu1 %vm74_vm0, %v61_v0  ;;  %v44_v3 = vld [vmem:[%s725_s1 + $0x70] sm:$0xff]  ;;  %v43_v5 = vld [vmem:[%s725_s1 + $0x68] sm:$0xff]  ;;  %23 = vst.msk [vmem:[#allocation2 + $0x8] sm:$0xff] %vm21_vm1, %v491_v35 }
   0x3   :  { %402 = vmatpush3.xpose.msk.msra.mxu0 %vm74_vm0, %v45_v1  ;;  %453 = vmatpush3.xpose.msk.msra.mxu1 %vm74_vm0, %v45_v1  ;;  %v58_v6 = vld [vmem:[%s725_s1 + $0xe0] sm:$0xff]  ;;  %v564_v9 = vld [vmem:[%s726_s0 + $0x8] sm:$0xff]  ;;  %v57_v10 = vld [vmem:[%s725_s1 + $0xd8] sm:$0xff]  ;;  %v65_v37 = vshrl.u32 %v64_v36, 7  ;;  %26 = vst.msk [vmem:[#allocation4] sm:$0xff] %vm21_vm1, %v492_v54  ;;  %v261_v62 = vand.u32 127, %v64_v36 }
   0x4   :  { %403 = vmatprep.subr.msk.mxu0 %vm74_vm0, %v60_v2  ;;  %438 = vmatprep.subr.msk.mxu1 %vm74_vm0, %v60_v2  ;;  %v554_v7 = vld [vmem:[%s726_s0] sm:$0xff]  ;;  %v41_v11 = vld [vmem:[%s725_s1 + $0x58] sm:$0xff]  ;;  %v56_v12 = vld [vmem:[%s725_s1 + $0xd0] sm:$0xff]  ;;  %24 = vst.msk [vmem:[#allocation3] sm:$0xff] %vm21_vm1, %v492_v54 }
   0x5   :  { %v42_v8 = vld [vmem:[%s725_s1 + $0x60] sm:$0xff]  ;;  %433 = vmatprep.mubr.msk.f32.mxu0 %vm74_vm0, %v554_v7  ;;  %435 = vmatprep.mubr.msk.f32.mxu1 %vm74_vm0, %v564_v9  ;;  %v40_v13 = vld [vmem:[%s725_s1 + $0x50] sm:$0xff]  ;;  %v55_v14 = vld [vmem:[%s725_s1 + $0xc8] sm:$0xff]  ;;  %v66_v38 = vsub.s32 0, %v65_v37  ;;  %v70_v39 = vsub.s32 1, %v65_v37  ;;  %25 = vst.msk [vmem:[#allocation3 + $0x8] sm:$0xff] %vm21_vm1, %v492_v54 }
   0x6   :  { %v39_v15 = vld [vmem:[%s725_s1 + $0x48] sm:$0xff]  ;;  %v54_v16 = vld [vmem:[%s725_s1 + $0xc0] sm:$0xff]  ;;  %v53_v18 = vld [vmem:[%s725_s1 + $0xb8] sm:$0xff]  ;;  %27 = vst.msk [vmem:[#allocation4 + $0x8] sm:$0xff] %vm21_vm1, %v492_v54  ;;  %v262_v1 = vadd.s32 128, %v261_v62 }
   0x7   :  { %404 = vmatpush3.xpose.msk.msra.mxu0 %vm74_vm0, %v44_v3  ;;  %454 = vmatpush3.xpose.msk.msra.mxu1 %vm74_vm0, %v44_v3  ;;  %v38_v17 = vld [vmem:[%s725_s1 + $0x40] sm:$0xff]  ;;  %v37_v19 = vld [vmem:[%s725_s1 + $0x38] sm:$0xff]  ;;  %v52_v20 = vld [vmem:[%s725_s1 + $0xb0] sm:$0xff] }
   0x8   :  { %405 = vmatprep.subr.msk.mxu0 %vm74_vm0, %v59_v4  ;;  %439 = vmatprep.subr.msk.mxu1 %vm74_vm0, %v59_v4  ;;  %v36_v21 = vld [vmem:[%s725_s1 + $0x30] sm:$0xff]  ;;  %v51_v22 = vld [vmem:[%s725_s1 + $0xa8] sm:$0xff]  ;;  %v50_v24 = vld [vmem:[%s725_s1 + $0xa0] sm:$0xff] }
   0x9   :  { %v35_v23 = vld [vmem:[%s725_s1 + $0x28] sm:$0xff]  ;;  %v34_v25 = vld [vmem:[%s725_s1 + $0x20] sm:$0xff]  ;;  %v49_v26 = vld [vmem:[%s725_s1 + $0x98] sm:$0xff] }
   0xa   :  { %v33_v27 = vld [vmem:[%s725_s1 + $0x18] sm:$0xff]  ;;  %v48_v28 = vld [vmem:[%s725_s1 + $0x90] sm:$0xff]  ;;  %v47_v30 = vld [vmem:[%s725_s1 + $0x88] sm:$0xff] }
   0xb   :  { %406 = vmatpush3.xpose.msk.msra.mxu0 %vm74_vm0, %v43_v5  ;;  %455 = vmatpush3.xpose.msk.msra.mxu1 %vm74_vm0, %v43_v5  ;;  %v32_v29 = vld [vmem:[%s725_s1 + $0x10] sm:$0xff]  ;;  %v31_v31 = vld [vmem:[%s725_s1 + $0x8] sm:$0xff]  ;;  %v46_v32 = vld [vmem:[%s725_s1 + $0x80] sm:$0xff] }
   0xc   :  { %407 = vmatprep.subr.msk.mxu0 %vm74_vm0, %v58_v6  ;;  %440 = vmatprep.subr.msk.mxu1 %vm74_vm0, %v58_v6  ;;  %v30_v33 = vld [vmem:[%s725_s1] sm:$0xff]  ;;  %v291_v58 = vld [vmem:[#allocation2 + $0x8] sm:$0xff]  ;;  %v301_v36 = vld [vmem:[#allocation3 + $0x8] sm:$0xff] }
   0xd   :  { %v62_v40 = vld [vmem:[%s727_s2] sm:$0x3]  ;;  %v255_v0 = vld [vmem:[%s728_s3 + $0x8] sm:$0xff] }
   0xe   :  { %v67_v41 = vrot.slane %v62_v40, %v66_v38  ;;  %v71_v42 = vrot.slane %v62_v40, %v70_v39  ;;  %v254_v53 = vld [vmem:[%s728_s3] sm:$0xff] }
   0xf   :  { %408 = vmatpush3.xpose.msk.msra.mxu0 %vm74_vm0, %v42_v8  ;;  %456 = vmatpush3.xpose.msk.msra.mxu1 %vm74_vm0, %v42_v8  ;;  %v290_v55 = vld [vmem:[#allocation2] sm:$0xff] }
  0x10   :  { %409 = vmatprep.subr.msk.mxu0 %vm74_vm0, %v57_v10  ;;  %441 = vmatprep.subr.msk.mxu1 %vm74_vm0, %v57_v10 }
  0x13   :  { %410 = vmatpush3.xpose.msk.msra.mxu0 %vm74_vm0, %v41_v11  ;;  %457 = vmatpush3.xpose.msk.msra.mxu1 %vm74_vm0, %v41_v11 }
  0x14   :  { %411 = vmatprep.subr.msk.mxu0 %vm74_vm0, %v56_v12  ;;  %442 = vmatprep.subr.msk.mxu1 %vm74_vm0, %v56_v12 }
  0x17   :  { %412 = vmatpush3.xpose.msk.msra.mxu0 %vm74_vm0, %v40_v13  ;;  %458 = vmatpush3.xpose.msk.msra.mxu1 %vm74_vm0, %v40_v13 }
  0x18   :  { %413 = vmatprep.subr.msk.mxu0 %vm74_vm0, %v55_v14  ;;  %443 = vmatprep.subr.msk.mxu1 %vm74_vm0, %v55_v14 }
  0x1b   :  { %414 = vmatpush3.xpose.msk.msra.mxu0 %vm74_vm0, %v39_v15  ;;  %459 = vmatpush3.xpose.msk.msra.mxu1 %vm74_vm0, %v39_v15 }
  0x1c   :  { %415 = vmatprep.subr.msk.mxu0 %vm74_vm0, %v54_v16  ;;  %444 = vmatprep.subr.msk.mxu1 %vm74_vm0, %v54_v16 }
  0x1f   :  { %416 = vmatpush3.xpose.msk.msra.mxu0 %vm74_vm0, %v38_v17  ;;  %460 = vmatpush3.xpose.msk.msra.mxu1 %vm74_vm0, %v38_v17 }
  0x20   :  { %417 = vmatprep.subr.msk.mxu0 %vm74_vm0, %v53_v18  ;;  %445 = vmatprep.subr.msk.mxu1 %vm74_vm0, %v53_v18 }
  0x23   :  { %418 = vmatpush3.xpose.msk.msra.mxu0 %vm74_vm0, %v37_v19  ;;  %461 = vmatpush3.xpose.msk.msra.mxu1 %vm74_vm0, %v37_v19 }
  0x24   :  { %419 = vmatprep.subr.msk.mxu0 %vm74_vm0, %v52_v20  ;;  %446 = vmatprep.subr.msk.mxu1 %vm74_vm0, %v52_v20 }
  0x27   :  { %420 = vmatpush3.xpose.msk.msra.mxu0 %vm74_vm0, %v36_v21  ;;  %462 = vmatpush3.xpose.msk.msra.mxu1 %vm74_vm0, %v36_v21 }
  0x28   :  { %421 = vmatprep.subr.msk.mxu0 %vm74_vm0, %v51_v22  ;;  %447 = vmatprep.subr.msk.mxu1 %vm74_vm0, %v51_v22 }
  0x2b   :  { %422 = vmatpush3.xpose.msk.msra.mxu0 %vm74_vm0, %v35_v23  ;;  %463 = vmatpush3.xpose.msk.msra.mxu1 %vm74_vm0, %v35_v23 }
  0x2c   :  { %423 = vmatprep.subr.msk.mxu0 %vm74_vm0, %v50_v24  ;;  %448 = vmatprep.subr.msk.mxu1 %vm74_vm0, %v50_v24 }
  0x2f   :  { %424 = vmatpush3.xpose.msk.msra.mxu0 %vm74_vm0, %v34_v25  ;;  %464 = vmatpush3.xpose.msk.msra.mxu1 %vm74_vm0, %v34_v25  ;;  %v263_v25 = vld [vmem:[#allocation4] sm:$0xff] }
  0x30   :  { %425 = vmatprep.subr.msk.mxu0 %vm74_vm0, %v49_v26  ;;  %449 = vmatprep.subr.msk.mxu1 %vm74_vm0, %v49_v26 }
  0x33   :  { %426 = vmatpush3.xpose.msk.msra.mxu0 %vm74_vm0, %v33_v27  ;;  %465 = vmatpush3.xpose.msk.msra.mxu1 %vm74_vm0, %v33_v27 }
  0x34   :  { %427 = vmatprep.subr.msk.mxu0 %vm74_vm0, %v48_v28  ;;  %450 = vmatprep.subr.msk.mxu1 %vm74_vm0, %v48_v28 }
  0x37   :  { %428 = vmatpush3.xpose.msk.msra.mxu0 %vm74_vm0, %v32_v29  ;;  %466 = vmatpush3.xpose.msk.msra.mxu1 %vm74_vm0, %v32_v29 }
  0x38   :  { %429 = vmatprep.subr.msk.mxu0 %vm74_vm0, %v47_v30  ;;  %451 = vmatprep.subr.msk.mxu1 %vm74_vm0, %v47_v30 }
  0x3b   :  { %430 = vmatpush3.xpose.msk.msra.mxu0 %vm74_vm0, %v31_v31  ;;  %467 = vmatpush3.xpose.msk.msra.mxu1 %vm74_vm0, %v31_v31 }
  0x3c   :  { %431 = vmatprep.subr.msk.mxu0 %vm74_vm0, %v46_v32  ;;  %452 = vmatprep.subr.msk.mxu1 %vm74_vm0, %v46_v32  ;;  %v300_v32 = vld [vmem:[#allocation3] sm:$0xff] }
  0x3f   :  { %432 = vmatpush3.xpose.msk.msra.mxu0 %vm74_vm0, %v30_v33  ;;  %468 = vmatpush3.xpose.msk.msra.mxu1 %vm74_vm0, %v30_v33 }
  0x42   :  { %434 = vmatmul.mubr.msk.f32.vlgmr.msra.gmra.mxu0 %vm74_vm0, %v554_v7  ;;  %436 = vmatmul.mubr.msk.f32.vlgmr.msra.gmra.mxu1 %vm74_vm0, %v564_v9 }
 0x102   :  { %v243_v43 = vpop.f32.mrf.mxu0  ;;  %v249_v44 = vpop.f32.mrf.mxu1 }
 0x103   :  { %v244_v47 = vadd.f32 %v243_v43, %v67_v41  ;;  %v250_v49 = vadd.f32 %v249_v44, %v67_v41  ;;  %v264_v41 = vld [vmem:[#allocation4 + $0x8] sm:$0xff] }
 0x104   :  { %v245_v45 = vpop.f32.mrf.mxu0  ;;  %v251_v46 = vpop.f32.mrf.mxu1 }
 0x105   :  { %v246_v48 = vadd.f32 %v245_v45, %v71_v42  ;;  %v252_v50 = vadd.f32 %v251_v46, %v71_v42 }
 0x107   :  { %v292_v51 = vmax.f32 %v244_v47, %v246_v48  ;;  %v295_v52 = vmax.f32 %v250_v49, %v252_v50 }
 0x109   :  { %293 = vmax.xlane.f32.xlu0 %v292_v51 }
 0x10d   :  { %296 = vmax.xlane.f32.xlu0 %v295_v52 }
 0x123   :  { %266 = vperm.xlu0 %473, %v254_v53  }
 0x192   :  { %v294_v56 = vpop.xlane.xlu0 %293 }
 0x193   :  { %v298_v57 = vmax.f32 %v290_v55, %v294_v56 }
 0x195   :  { %v302_v59 = vsub.f32 %v290_v55, %v298_v57  ;;  %342 = vst.msk [vmem:[#allocation2] sm:$0xff] %vm21_vm1, %v298_v57  ;;  %312 = vperm.xlu1 %472, %v298_v57  }
 0x196   :  { %v297_v60 = vpop.xlane.xlu0 %296 }
 0x197   :  { %v299_v61 = vmax.f32 %v291_v58, %v297_v60  ;;  %v304_v29 = vmul.f32 1.442695, %v302_v59 }
 0x199   :  { %v303_v63 = vsub.f32 %v291_v58, %v299_v61  ;;  %343 = vst.msk [vmem:[#allocation2 + $0x8] sm:$0xff] %vm21_vm1, %v299_v61  ;;  %317 = vperm.xlu1 %472, %v299_v61  }
 0x19b   :  { %v306_v30 = vmul.f32 1.442695, %v303_v63 }
 0x19d   :  { %269 = vperm.xlu1 %472, %v255_v0  }
 0x19e   :  { %v267_v2 = vpop.permute.xlu0 %266 }
 0x19f   :  { %vm271_vm2 = vcmp.eq.s32.totalorder %v261_v62, %v267_v2  ;;  %vm272_vm3 = vcmp.eq.s32.totalorder %v262_v1, %v267_v2 }
 0x1a0   :  { %v275_v3 = vsel %vm271_vm2, %v244_v47, 0.0  ;;  %v276_v4 = vsel %vm272_vm3, %v246_v48, 0.0  ;;  %v350_v54 = vld [vmem:[#allocation2 + $0x8] sm:$0xff] }
 0x1a1   :  { %v279_v5 = vadd.f32 %v276_v4, %v275_v3 }
 0x1a3   :  { %280 = vadd.xlane.f32.xlu0 %v279_v5 }
 0x210   :  { %v313_v6 = vpop.permute.xlu1 %312 }
 0x211   :  { %v320_v7 = vsub.f32 %v244_v47, %v313_v6  ;;  %v321_v8 = vsub.f32 %v246_v48, %v313_v6  ;;  %v349_v48 = vld [vmem:[#allocation2] sm:$0xff] }
 0x213   :  { %v324_v9 = vmul.f32 1.442695, %v320_v7  ;;  %v326_v10 = vmul.f32 1.442695, %v321_v8 }
 0x214   :  { %v318_v11 = vpop.permute.xlu1 %317 }
 0x215   :  { %474 = vpow2.f32 %v324_v9  ;;  %v322_v12 = vsub.f32 %v250_v49, %v318_v11  ;;  %v323_v13 = vsub.f32 %v252_v50, %v318_v11 }
 0x216   :  { %476 = vpow2.f32 %v326_v10 }
 0x217   :  { %v328_v14 = vmul.f32 1.442695, %v322_v12  ;;  %v330_v15 = vmul.f32 1.442695, %v323_v13 }
 0x218   :  { %v270_v18 = vpop.permute.xlu1 %269 }
 0x219   :  { %478 = vpow2.f32 %v328_v14  ;;  %vm273_vm4 = vcmp.eq.s32.totalorder %v261_v62, %v270_v18  ;;  %vm274_vm5 = vcmp.eq.s32.totalorder %v262_v1, %v270_v18 }
 0x21a   :  { %480 = vpow2.f32 %v330_v15  ;;  %v277_v23 = vsel %vm273_vm4, %v250_v49, 0.0  ;;  %v278_v24 = vsel %vm274_vm5, %v252_v50, 0.0 }
 0x21b   :  { %v282_v27 = vadd.f32 %v278_v24, %v277_v23  ;;  %482 = vpow2.f32 %v304_v29 }
 0x21c   :  { %484 = vpow2.f32 %v306_v30 }
 0x222   :  { %v475_v16 = vpop.eup %474 }
 0x223   :  { %v477_v17 = vpop.eup %476 }
 0x224   :  { %v332_v19 = vadd.f32 %v477_v17, %v475_v16 }
 0x226   :  { %v479_v20 = vpop.eup %478  ;;  %333 = vadd.xlane.f32.xlu1 %v332_v19 }
 0x227   :  { %v481_v21 = vpop.eup %480 }
 0x228   :  { %v335_v22 = vadd.f32 %v481_v21, %v479_v20  ;;  %v483_v31 = vpop.eup %482 }
 0x229   :  { %v308_v33 = vmul.f32 %v483_v31, %v300_v32  ;;  %v485_v34 = vpop.eup %484 }
 0x22a   :  { %336 = vadd.xlane.f32.xlu1 %v335_v22  ;;  %v309_v38 = vmul.f32 %v485_v34, %v301_v36 }
 0x22c   :  { %v281_v26 = vpop.xlane.xlu0 %280 }
 0x22d   :  { %v285_v28 = vadd.f32 %v281_v26, %v263_v25 }
 0x22e   :  { %283 = vadd.xlane.f32.xlu1 %v282_v27 }
 0x22f   :  { %288 = vst.msk [vmem:[#allocation4] sm:$0xff] %vm21_vm1, %v285_v28 }
 0x236   :  { %v347_v51 = vld [vmem:[#allocation4] sm:$0xff] }
 0x2af   :  { %v334_v35 = vpop.xlane.xlu1 %333 }
 0x2b0   :  { %v338_v37 = vadd.f32 %v334_v35, %v308_v33 }
 0x2b2   :  { %340 = vst.msk [vmem:[#allocation3] sm:$0xff] %vm21_vm1, %v338_v37 }
 0x2b3   :  { %v337_v39 = vpop.xlane.xlu1 %336 }
 0x2b4   :  { %v339_v40 = vadd.f32 %v337_v39, %v309_v38 }
 0x2b6   :  { %341 = vst.msk [vmem:[#allocation3 + $0x8] sm:$0xff] %vm21_vm1, %v339_v40 }
 0x2b7   :  { %v284_v42 = vpop.xlane.xlu1 %283 }
 0x2b8   :  { %v286_v43 = vadd.f32 %v284_v42, %v264_v41 }
 0x2b9   :  { %v351_v44 = vld [vmem:[#allocation3] sm:$0xff] }
 0x2ba   :  { %486 = vlog2.f32 %v351_v44  ;;  %289 = vst.msk [vmem:[#allocation4 + $0x8] sm:$0xff] %vm21_vm1, %v286_v43 }
 0x2bd   :  { %v352_v45 = vld [vmem:[#allocation3 + $0x8] sm:$0xff] }
 0x2be   :  { %488 = vlog2.f32 %v352_v45 }
 0x2c1   :  { %v348_v56 = vld [vmem:[#allocation4 + $0x8] sm:$0xff] }
 0x2c7   :  { %v487_v46 = vpop.eup %486 }
 0x2c8   :  { %v354_v47 = vmul.f32 0.6931472, %v487_v46 }
 0x2ca   :  { %v357_v49 = vadd.f32 %v354_v47, %v349_v48 }
 0x2cb   :  { %v489_v50 = vpop.eup %488 }
 0x2cc   :  { %v359_v52 = vsub.f32 %v347_v51, %v357_v49  ;;  %v356_v53 = vmul.f32 0.6931472, %v489_v50 }
 0x2ce   :  { %v358_v55 = vadd.f32 %v356_v53, %v350_v54  ;;  %361 = vst.msk [vmem:[%s729_s4] sm:$0xff] %vm21_vm1, %v359_v52 }
 0x2d0   :  { %v360_v57 = vsub.f32 %v348_v56, %v358_v55 }
 0x2d2   :  { %362 = vst.msk [vmem:[%s729_s4 + $0x8] sm:$0xff] %vm21_vm1, %v360_v57 }

</bundles_post_ra>
